<compile_context>
chip_gen: v7x
topology: tpu7x:2x2x1
jax: 0.10.0
libtpu: 0.0.40
codegen_flags: <defaults>
</compile_context>

<pallas_src>
import functools

import jax
import jax.numpy as jnp
import numpy as np
from jax.experimental import pallas as pl
from jax.experimental.pallas import tpu as pltpu


# ----------------------------------------------------------------------------
# Shared in-kernel helpers.
# ----------------------------------------------------------------------------
def _gate_from_stats(avg, mx, w1, b1, w2, b2, wfa, wfm, bf):
    """Column-form channel-gate MLP.

    avg / mx are (C, 1) f32 columns.  Weights are PyTorch-native (out, in)
    layouts, biases are (out, 1) columns, the fusion weight is pre-split into
    its avg / max halves — so the whole gate stays in column form and the
    shared MLP runs once on the stacked (C, 2) stats.
    """
    v = jnp.concatenate([avg, mx], axis=1)                              # (C, 2)
    h = jnp.maximum(
        jnp.dot(w1, v, preferred_element_type=jnp.float32) + b1, 0.0)   # (Ch, 2)
    o = jnp.dot(w2, h, preferred_element_type=jnp.float32) + b2         # (C, 2)
    fused = (jnp.dot(wfa, o[:, 0:1], preferred_element_type=jnp.float32)
             + jnp.dot(wfm, o[:, 1:2], preferred_element_type=jnp.float32)
             + bf)                                                      # (C, 1)
    return 1.0 / (1.0 + jnp.exp(-fused))


def _masked_sum_max(x_f32, s_idx, tile_s, s_total):
    """Per-tile (C, 1) sum / max; masks the tail tile (sum->0, max->-inf)."""
    if s_total % tile_s != 0:
        lane = jax.lax.broadcasted_iota(jnp.int32, x_f32.shape, 1)
        valid = (s_idx * tile_s + lane) < s_total
        x_sum = jnp.where(valid, x_f32, 0.0)
        x_max = jnp.where(valid, x_f32, -jnp.inf)
    else:
        x_sum, x_max = x_f32, x_f32
    return (jnp.sum(x_sum, axis=-1, keepdims=True),
            jnp.max(x_max, axis=-1, keepdims=True))


# ----------------------------------------------------------------------------
# Fused kernel: single HBM read of x + single HBM write of out.
#   grid = (N, nS); x block (1, C, tS) streams in; out block (1, C, S) stays
#   resident in VMEM across the S axis and is scaled in place at the last step.
# ----------------------------------------------------------------------------
def _fused_kernel(x_ref, w1_ref, b1_ref, w2_ref, b2_ref, wfa_ref, wfm_ref,
                  bf_ref, out_ref, sum_acc, max_acc, *, inv_s, s_total, tile_s):
    s = pl.program_id(1)
    n_s = pl.num_programs(1)
    tail = s_total % tile_s

    @pl.when(s == 0)
    def _():
        sum_acc[...] = jnp.zeros_like(sum_acc)
        max_acc[...] = jnp.full_like(max_acc, -jnp.inf)

    x = x_ref[0]                                            # (C, tS), x dtype
    ps, pm = _masked_sum_max(x.astype(jnp.float32), s, tile_s, s_total)
    sum_acc[...] += ps
    max_acc[...] = jnp.maximum(max_acc[...], pm)

    # Stage the raw tile into the VMEM-resident output slab for this batch.
    start = pl.multiple_of(s * tile_s, 128)
    if tail == 0:
        out_ref[0, :, pl.ds(start, tile_s)] = x
    else:
        @pl.when(s < n_s - 1)
        def _():
            out_ref[0, :, pl.ds(start, tile_s)] = x

        @pl.when(s == n_s - 1)
        def _():
            out_ref[0, :, pl.ds(start, tail)] = x[:, :tail]

    @pl.when(s == n_s - 1)
    def _():
        gate = _gate_from_stats(
            sum_acc[...] * inv_s, max_acc[...],
            w1_ref[...], b1_ref[...], w2_ref[...], b2_ref[...],
            wfa_ref[...], wfm_ref[...], bf_ref[...])        # (C, 1) f32

        n_full = s_total // tile_s

        # Scale the resident slab chunk-by-chunk (keeps f32 temporaries small).
        @pl.loop(0, n_full)
        def _(i):
            st = pl.multiple_of(i * tile_s, 128)
            blk = out_ref[0, :, pl.ds(st, tile_s)]
            out_ref[0, :, pl.ds(st, tile_s)] = (
                blk.astype(jnp.float32) * gate).astype(out_ref.dtype)

        if tail:
            st_t = n_full * tile_s
            blk = out_ref[0, :, pl.ds(st_t, tail)]
            out_ref[0, :, pl.ds(st_t, tail)] = (
                blk.astype(jnp.float32) * gate).astype(out_ref.dtype)


# ----------------------------------------------------------------------------
# Two-pass fallback (slab does not fit VMEM).
# Pass 1: pipelined spatial reduction + gate MLP.  Pass 2: streamed scale.
# ----------------------------------------------------------------------------
def _reduce_gate_kernel(x_ref, w1_ref, b1_ref, w2_ref, b2_ref, wfa_ref,
                        wfm_ref, bf_ref, gate_ref, sum_acc, max_acc,
                        *, inv_s, s_total, tile_s):
    s = pl.program_id(1)

    @pl.when(s == 0)
    def _():
        sum_acc[...] = jnp.zeros_like(sum_acc)
        max_acc[...] = jnp.full_like(max_acc, -jnp.inf)

    ps, pm = _masked_sum_max(x_ref[0].astype(jnp.float32), s, tile_s, s_total)
    sum_acc[...] += ps
    max_acc[...] = jnp.maximum(max_acc[...], pm)

    @pl.when(s == pl.num_programs(1) - 1)
    def _():
        gate_ref[0] = _gate_from_stats(
            sum_acc[...] * inv_s, max_acc[...],
            w1_ref[...], b1_ref[...], w2_ref[...], b2_ref[...],
            wfa_ref[...], wfm_ref[...], bf_ref[...])


def _scale_kernel(gate_ref, x_ref, out_ref):
    g = gate_ref[0]                                         # (C, 1) f32 gate
    out_ref[0] = (x_ref[0].astype(jnp.float32) * g).astype(out_ref.dtype)


# ----------------------------------------------------------------------------
# Sizing helpers.
# ----------------------------------------------------------------------------
def _vmem_budget_bytes():
    """Per-generation VMEM budget for resident data + pipeline buffers."""
    cap = 64 << 20                      # conservative default: v7x (64 MiB/TC)
    try:
        cap = int(pltpu.get_tpu_info().vmem_capacity_bytes)
    except Exception:
        pass
    # Leave headroom for compiler scratch / spills / semaphores.
    return min(int(cap * 0.55), 96 << 20)


def _pick_tile_s(S, C, itemsize, target_bytes):
    """Lane-dense spatial tile sized by bytes (multiple of 128 lanes), or S
    itself when a single tile already covers the whole spatial extent."""
    per_lane = max(1, C * itemsize)
    t = max(128, int((target_bytes // per_lane) // 128 * 128))
    return S if t >= S else t


# ----------------------------------------------------------------------------
# Wrapper.
# ----------------------------------------------------------------------------
def channel_gate(x, params, *, force_two_pass=False):
    """params = (w1, b1, w2, b2, wf, bf) in PyTorch nn.Linear layouts."""
    w1, b1, w2, b2, wf, bf = params
    N, C = x.shape[:2]
    S = int(np.prod(x.shape[2:]))
    Ch = w1.shape[0]
    dtype = x.dtype
    itemsize = jnp.dtype(dtype).itemsize
    inv_s = 1.0 / S

    xf = x.reshape(N, C, S)

    # Weights in f32 (out, in) layouts, biases as columns; split the fusion
    # weight into the halves acting on mlp(avg) and mlp(max).
    w1f = w1.astype(jnp.float32)
    b1c = b1.reshape(Ch, 1).astype(jnp.float32)
    w2f = w2.astype(jnp.float32)
    b2c = b2.reshape(C, 1).astype(jnp.float32)
    wfa = wf[:, :C].astype(jnp.float32)
    wfm = wf[:, C:].astype(jnp.float32)
    bfc = bf.reshape(C, 1).astype(jnp.float32)
    weights = (w1f, b1c, w2f, b2c, wfa, wfm, bfc)
    weight_bytes = sum(int(np.prod(a.shape)) * 4 for a in weights)

    def wspec(a):
        return pl.BlockSpec(a.shape, lambda n, s: (0, 0))
    weight_specs = [wspec(a) for a in weights]

    budget = _vmem_budget_bytes()
    reduce_cparams = lambda: pltpu.CompilerParams(
        dimension_semantics=("parallel", "arbitrary"),
        vmem_limit_bytes=int(budget))

    # ---- fused single-pass feasibility (per-generation VMEM gate) ----
    slab_bytes = C * S * itemsize
    tile_f = _pick_tile_s(S, C, itemsize, target_bytes=2 << 20)
    fused_need = (2 * slab_bytes                   # resident out slab (dbl-buf)
                  + 2 * C * tile_f * itemsize      # streamed input tile (dbl-buf)
                  + 4 * C * tile_f * 4             # f32 temporaries in epilogue
                  + 2 * weight_bytes + (2 << 20))  # misc headroom
    use_fused = (not force_two_pass) and fused_need <= budget

    if use_fused:
        out = pl.pallas_call(
            functools.partial(_fused_kernel, inv_s=inv_s,
                              s_total=S, tile_s=tile_f),
            out_shape=jax.ShapeDtypeStruct((N, C, S), dtype),
            grid_spec=pltpu.PrefetchScalarGridSpec(
                num_scalar_prefetch=0,
                grid=(N, pl.cdiv(S, tile_f)),
                in_specs=[pl.BlockSpec((1, C, tile_f), lambda n, s: (n, 0, s))]
                         + weight_specs,
                out_specs=pl.BlockSpec((1, C, S), lambda n, s: (n, 0, 0)),
                scratch_shapes=[pltpu.VMEM((C, 1), jnp.float32),
                                pltpu.VMEM((C, 1), jnp.float32)],
            ),
            compiler_params=reduce_cparams(),
        )(xf, *weights)
        return out.reshape(x.shape)

    # ---- Pass 1: spatial reduction + gate MLP (input-only buffering) ----
    tile_1 = _pick_tile_s(S, C, itemsize, target_bytes=4 << 20)
    gate = pl.pallas_call(
        functools.partial(_reduce_gate_kernel, inv_s=inv_s,
                          s_total=S, tile_s=tile_1),
        out_shape=jax.ShapeDtypeStruct((N, C, 1), jnp.float32),
        grid_spec=pltpu.PrefetchScalarGridSpec(
            num_scalar_prefetch=0,
            grid=(N, pl.cdiv(S, tile_1)),
            in_specs=[pl.BlockSpec((1, C, tile_1), lambda n, s: (n, 0, s))]
                     + weight_specs,
            out_specs=pl.BlockSpec((1, C, 1), lambda n, s: (n, 0, 0)),
            scratch_shapes=[pltpu.VMEM((C, 1), jnp.float32),
                            pltpu.VMEM((C, 1), jnp.float32)],
        ),
        compiler_params=reduce_cparams(),
    )(xf, *weights)

    # ---- Pass 2: streamed per-channel scale (in + out double-buffered) ----
    tile_2 = _pick_tile_s(S, C, itemsize, target_bytes=2 << 20)
    out = pl.pallas_call(
        _scale_kernel,
        out_shape=jax.ShapeDtypeStruct((N, C, S), dtype),
        grid_spec=pltpu.PrefetchScalarGridSpec(
            num_scalar_prefetch=0,
            grid=(N, pl.cdiv(S, tile_2)),
            in_specs=[pl.BlockSpec((1, C, 1), lambda n, s: (n, 0, 0)),
                      pl.BlockSpec((1, C, tile_2), lambda n, s: (n, 0, s))],
            out_specs=pl.BlockSpec((1, C, tile_2), lambda n, s: (n, 0, s)),
        ),
        compiler_params=pltpu.CompilerParams(
            dimension_semantics=("parallel", "parallel"),
            vmem_limit_bytes=int(budget)),
    )(gate, xf)

    return out.reshape(x.shape)


# ----------------------------------------------------------------------------
# Pure-JAX reference (mirrors the PyTorch forward) for correctness checks.
# ----------------------------------------------------------------------------
def reference_forward(x, params):
    w1, b1, w2, b2, wf, bf = params
    N, C = x.shape[:2]
    xf = x.reshape(N, C, -1)
    avg = xf.mean(axis=-1)
    mx = xf.max(axis=-1)

    def mlp(v):
        return jnp.maximum(v @ w1.T + b1, 0.0) @ w2.T + b2

    cat = jnp.concatenate([mlp(avg), mlp(mx)], axis=1)
    gate = jax.nn.sigmoid(cat @ wf.T + bf)
    return x * gate[:, :, None, None, None]


if __name__ == "__main__":
    key = jax.random.PRNGKey(0)
    N, C, D, H, W = 2, 8, 16, 16, 16
    reduction_ratio = 2                       # ChannelGate default
    Ch = C // reduction_ratio

    ks = jax.random.split(key, 7)
    x = jax.random.normal(ks[0], (N, C, D, H, W), jnp.float32)

    # Deterministic synthetic parameters, PyTorch Linear layouts (out, in).
    w1 = jax.random.normal(ks[1], (Ch, C), jnp.float32) * 0.5    # Linear(C, C//r)
    b1 = jax.random.normal(ks[2], (Ch,), jnp.float32) * 0.1
    w2 = jax.random.normal(ks[3], (C, Ch), jnp.float32) * 0.5    # Linear(C//r, C)
    b2 = jax.random.normal(ks[4], (C,), jnp.float32) * 0.1
    wf = jax.random.normal(ks[5], (C, 2 * C), jnp.float32) * 0.5  # Linear(2C, C)
    bf = jax.random.normal(ks[6], (C,), jnp.float32) * 0.1
    params = (w1, b1, w2, b2, wf, bf)

    ref = reference_forward(x, params)

    # Fused single-pass path (slab fits VMEM at this shape).
    out_fused = jax.block_until_ready(channel_gate(x, params))
    np.testing.assert_allclose(np.asarray(out_fused), np.asarray(ref),
                               rtol=1e-4, atol=1e-4)

    # Two-pass fallback path (forced) — used when the slab exceeds VMEM.
    out_2pass = jax.block_until_ready(
        channel_gate(x, params, force_two_pass=True))
    np.testing.assert_allclose(np.asarray(out_2pass), np.asarray(ref),
                               rtol=1e-4, atol=1e-4)

    print("KERNEL_OK")
</pallas_src>

<mosaic_0001>
module attributes {stable_mosaic.version = 11 : i64} {
  func.func @_fused_kernel(%arg0: i32, %arg1: i32, %arg2: memref<1x8x4096xf32, #tpu.memory_space<vmem>>, %arg3: memref<4x8xf32, #tpu.memory_space<vmem>>, %arg4: memref<4x1xf32, #tpu.memory_space<vmem>>, %arg5: memref<8x4xf32, #tpu.memory_space<vmem>>, %arg6: memref<8x1xf32, #tpu.memory_space<vmem>>, %arg7: memref<8x8xf32, #tpu.memory_space<vmem>>, %arg8: memref<8x8xf32, #tpu.memory_space<vmem>>, %arg9: memref<8x1xf32, #tpu.memory_space<vmem>>, %arg10: memref<1x8x4096xf32, #tpu.memory_space<vmem>>, %arg11: memref<8x1xf32, #tpu.memory_space<vmem>>, %arg12: memref<8x1xf32, #tpu.memory_space<vmem>>) attributes {dimension_semantics = [#tpu.dimension_semantics<parallel>, #tpu.dimension_semantics<arbitrary>], iteration_bounds = array<i64: 2, 1>, scalar_prefetch = 0 : i64, scratch_operands = 2 : i64, tpu.core_type = #tpu.core_type<tc>, window_params = [{transform_indices = @transform_0, window_bounds = array<i64: 1, 8, 4096>}, {pipeline_mode = #tpu.pipeline_mode<synchronous>, transform_indices = @transform_1, window_bounds = array<i64: 4, 8>}, {pipeline_mode = #tpu.pipeline_mode<synchronous>, transform_indices = @transform_2, window_bounds = array<i64: 4, 1>}, {pipeline_mode = #tpu.pipeline_mode<synchronous>, transform_indices = @transform_3, window_bounds = array<i64: 8, 4>}, {pipeline_mode = #tpu.pipeline_mode<synchronous>, transform_indices = @transform_4, window_bounds = array<i64: 8, 1>}, {pipeline_mode = #tpu.pipeline_mode<synchronous>, transform_indices = @transform_5, window_bounds = array<i64: 8, 8>}, {pipeline_mode = #tpu.pipeline_mode<synchronous>, transform_indices = @transform_6, window_bounds = array<i64: 8, 8>}, {pipeline_mode = #tpu.pipeline_mode<synchronous>, transform_indices = @transform_7, window_bounds = array<i64: 8, 1>}, {transform_indices = @transform_8, window_bounds = array<i64: 1, 8, 4096>}]} {
    %c0_i32 = arith.constant 0 : i32
    %0 = arith.cmpi eq, %arg1, %c0_i32 : i32
    %1 = arith.extui %0 : i1 to i32
    %c0_i32_0 = arith.constant 0 : i32
    %2 = arith.cmpi ne, %1, %c0_i32_0 : i32
    scf.if %2 {
      %cst_16 = arith.constant 0.000000e+00 : f32
      %24 = vector.broadcast %cst_16 : f32 to vector<8x1xf32>
      %c0_17 = arith.constant 0 : index
      %c0_18 = arith.constant 0 : index
      %25 = vector.load %arg11[%c0_17, %c0_18] : memref<8x1xf32, #tpu.memory_space<vmem>>, vector<8x1xf32>
      tpu.vector_store %arg11[%c0_17, %c0_18], %24 {strides = array<i32>} : memref<8x1xf32, #tpu.memory_space<vmem>>, vector<8x1xf32>,
      %cst_19 = arith.constant 0xFF800000 : f32
      %26 = vector.broadcast %cst_19 : f32 to vector<8x1xf32>
      %c0_20 = arith.constant 0 : index
      %c0_21 = arith.constant 0 : index
      %27 = vector.load %arg12[%c0_20, %c0_21] : memref<8x1xf32, #tpu.memory_space<vmem>>, vector<8x1xf32>
      tpu.vector_store %arg12[%c0_20, %c0_21], %26 {strides = array<i32>} : memref<8x1xf32, #tpu.memory_space<vmem>>, vector<8x1xf32>,
    } else {
    }
    %c0 = arith.constant 0 : index
    %c0_1 = arith.constant 0 : index
    %c0_2 = arith.constant 0 : index
    %3 = vector.load %arg2[%c0, %c0_1, %c0_2] : memref<1x8x4096xf32, #tpu.memory_space<vmem>>, vector<1x8x4096xf32>
    %4 = vector.shape_cast %3 : vector<1x8x4096xf32> to vector<8x4096xf32>
    %cst = arith.constant dense<0.000000e+00> : vector<8xf32>
    %5 = vector.multi_reduction <add>, %4, %cst [1] : vector<8x4096xf32> to vector<8xf32>
    %6 = vector.shape_cast %5 : vector<8xf32> to vector<8x1xf32>
    %cst_3 = arith.constant dense<0xFF800000> : vector<8xf32>
    %7 = vector.multi_reduction <maximumf>, %4, %cst_3 [1] : vector<8x4096xf32> to vector<8xf32>
    %8 = vector.shape_cast %7 : vector<8xf32> to vector<8x1xf32>
    %c0_4 = arith.constant 0 : index
    %c0_5 = arith.constant 0 : index
    %9 = vector.load %arg11[%c0_4, %c0_5] : memref<8x1xf32, #tpu.memory_space<vmem>>, vector<8x1xf32>
    %10 = arith.addf %9, %6 : vector<8x1xf32>
    %c0_6 = arith.constant 0 : index
    %c0_7 = arith.constant 0 : index
    %11 = vector.load %arg11[%c0_6, %c0_7] : memref<8x1xf32, #tpu.memory_space<vmem>>, vector<8x1xf32>
    tpu.vector_store %arg11[%c0_6, %c0_7], %10 {strides = array<i32>} : memref<8x1xf32, #tpu.memory_space<vmem>>, vector<8x1xf32>,
    %c0_8 = arith.constant 0 : index
    %c0_9 = arith.constant 0 : index
    %12 = vector.load %arg12[%c0_8, %c0_9] : memref<8x1xf32, #tpu.memory_space<vmem>>, vector<8x1xf32>
    %13 = arith.maximumf %12, %8 : vector<8x1xf32>
    %c0_10 = arith.constant 0 : index
    %c0_11 = arith.constant 0 : index
    %14 = vector.load %arg12[%c0_10, %c0_11] : memref<8x1xf32, #tpu.memory_space<vmem>>, vector<8x1xf32>
    tpu.vector_store %arg12[%c0_10, %c0_11], %13 {strides = array<i32>} : memref<8x1xf32, #tpu.memory_space<vmem>>, vector<8x1xf32>,
    %c4096_i32 = arith.constant 4096 : i32
    %15 = arith.muli %arg1, %c4096_i32 : i32
    %16 = tpu.assume_multiple %15, 128 : i32
    %c0_12 = arith.constant 0 : index
    %c0_13 = arith.constant 0 : index
    %17 = arith.index_cast %16 : i32 to index
    %18 = vector.load %arg10[%c0_12, %c0_13, %17] : memref<1x8x4096xf32, #tpu.memory_space<vmem>>, vector<1x8x4096xf32>
    %19 = vector.shape_cast %18 : vector<1x8x4096xf32> to vector<8x4096xf32>
    %20 = vector.shape_cast %4 : vector<8x4096xf32> to vector<1x8x4096xf32>
    tpu.vector_store %arg10[%c0_12, %c0_13, %17], %20 {strides = array<i32>} : memref<1x8x4096xf32, #tpu.memory_space<vmem>>, vector<1x8x4096xf32>,
    %c0_i32_14 = arith.constant 0 : i32
    %21 = arith.cmpi eq, %arg1, %c0_i32_14 : i32
    %22 = arith.extui %21 : i1 to i32
    %c0_i32_15 = arith.constant 0 : i32
    %23 = arith.cmpi ne, %22, %c0_i32_15 : i32
    scf.if %23 {
      %c0_16 = arith.constant 0 : index
      %c0_17 = arith.constant 0 : index
      %24 = vector.load %arg11[%c0_16, %c0_17] : memref<8x1xf32, #tpu.memory_space<vmem>>, vector<8x1xf32>
      %cst_18 = arith.constant 2.44140625E-4 : f32
      %25 = vector.broadcast %cst_18 : f32 to vector<8x1xf32>
      %26 = arith.mulf %24, %25 : vector<8x1xf32>
      %c0_19 = arith.constant 0 : index
      %c0_20 = arith.constant 0 : index
      %27 = vector.load %arg12[%c0_19, %c0_20] : memref<8x1xf32, #tpu.memory_space<vmem>>, vector<8x1xf32>
      %c0_21 = arith.constant 0 : index
      %c0_22 = arith.constant 0 : index
      %28 = vector.load %arg3[%c0_21, %c0_22] : memref<4x8xf32, #tpu.memory_space<vmem>>, vector<4x8xf32>
      %c0_23 = arith.constant 0 : index
      %c0_24 = arith.constant 0 : index
      %29 = vector.load %arg4[%c0_23, %c0_24] : memref<4x1xf32, #tpu.memory_space<vmem>>, vector<4x1xf32>
      %c0_25 = arith.constant 0 : index
      %c0_26 = arith.constant 0 : index
      %30 = vector.load %arg5[%c0_25, %c0_26] : memref<8x4xf32, #tpu.memory_space<vmem>>, vector<8x4xf32>
      %c0_27 = arith.constant 0 : index
      %c0_28 = arith.constant 0 : index
      %31 = vector.load %arg6[%c0_27, %c0_28] : memref<8x1xf32, #tpu.memory_space<vmem>>, vector<8x1xf32>
      %c0_29 = arith.constant 0 : index
      %c0_30 = arith.constant 0 : index
      %32 = vector.load %arg7[%c0_29, %c0_30] : memref<8x8xf32, #tpu.memory_space<vmem>>, vector<8x8xf32>
      %c0_31 = arith.constant 0 : index
      %c0_32 = arith.constant 0 : index
      %33 = vector.load %arg8[%c0_31, %c0_32] : memref<8x8xf32, #tpu.memory_space<vmem>>, vector<8x8xf32>
      %c0_33 = arith.constant 0 : index
      %c0_34 = arith.constant 0 : index
      %34 = vector.load %arg9[%c0_33, %c0_34] : memref<8x1xf32, #tpu.memory_space<vmem>>, vector<8x1xf32>
      %35 = tpu.concatenate %26, %27 in 1 : vector<8x1xf32>, vector<8x1xf32> -> vector<8x2xf32>
      %cst_35 = arith.constant dense<0.000000e+00> : vector<4x2xf32>
      %36 = tpu.matmul %28, %35, %cst_35 {dimension_numbers = #tpu.dot_dimension_numbers<[1], [0], [0], [1], [0, 0, 1, 1], [], []>} : vector<4x8xf32>, vector<8x2xf32>, vector<4x2xf32> -> vector<4x2xf32>
      %37 = vector.broadcast %29 : vector<4x1xf32> to vector<4x2xf32>
      %38 = arith.addf %36, %37 : vector<4x2xf32>
      %cst_36 = arith.constant 0.000000e+00 : f32
      %39 = vector.broadcast %cst_36 : f32 to vector<4x2xf32>
      %40 = arith.maximumf %38, %39 : vector<4x2xf32>
      %cst_37 = arith.constant dense<0.000000e+00> : vector<8x2xf32>
      %41 = tpu.matmul %30, %40, %cst_37 {dimension_numbers = #tpu.dot_dimension_numbers<[1], [0], [0], [1], [0, 0, 1, 1], [], []>} : vector<8x4xf32>, vector<4x2xf32>, vector<8x2xf32> -> vector<8x2xf32>
      %42 = vector.broadcast %31 : vector<8x1xf32> to vector<8x2xf32>
      %43 = arith.addf %41, %42 : vector<8x2xf32>
      %44 = vector.extract_strided_slice %43 {offsets = [0, 0], sizes = [8, 1], strides = [1, 1]} : vector<8x2xf32> to vector<8x1xf32>
      %cst_38 = arith.constant dense<0.000000e+00> : vector<8x1xf32>
      %45 = tpu.matmul %32, %44, %cst_38 {dimension_numbers = #tpu.dot_dimension_numbers<[1], [0], [0], [1], [0, 0, 1, 1], [], []>} : vector<8x8xf32>, vector<8x1xf32>, vector<8x1xf32> -> vector<8x1xf32>
      %46 = vector.extract_strided_slice %43 {offsets = [0, 1], sizes = [8, 1], strides = [1, 1]} : vector<8x2xf32> to vector<8x1xf32>
      %cst_39 = arith.constant dense<0.000000e+00> : vector<8x1xf32>
      %47 = tpu.matmul %33, %46, %cst_39 {dimension_numbers = #tpu.dot_dimension_numbers<[1], [0], [0], [1], [0, 0, 1, 1], [], []>} : vector<8x8xf32>, vector<8x1xf32>, vector<8x1xf32> -> vector<8x1xf32>
      %48 = arith.addf %45, %47 : vector<8x1xf32>
      %49 = arith.addf %48, %34 : vector<8x1xf32>
      %cst_40 = arith.constant 0.000000e+00 : f32
      %50 = vector.broadcast %cst_40 : f32 to vector<8x1xf32>
      %51 = arith.subf %50, %49 : vector<8x1xf32>
      %52 = math.exp %51 : vector<8x1xf32>
      %cst_41 = arith.constant 1.000000e+00 : f32
      %53 = vector.broadcast %cst_41 : f32 to vector<8x1xf32>
      %54 = arith.addf %53, %52 : vector<8x1xf32>
      %cst_42 = arith.constant 1.000000e+00 : f32
      %55 = vector.broadcast %cst_42 : f32 to vector<8x1xf32>
      %56 = arith.divf %55, %54 : vector<8x1xf32>
      %c0_i32_43 = arith.constant 0 : i32
      %c1_i32 = arith.constant 1 : i32
      %57 = arith.muli %c0_i32_43, %c1_i32 : i32
      %c0_i32_44 = arith.constant 0 : i32
      %58 = arith.addi %c0_i32_44, %57 : i32
      %c4096_i32_45 = arith.constant 4096 : i32
      %59 = arith.muli %58, %c4096_i32_45 : i32
      %60 = tpu.assume_multiple %59, 128 : i32
      %c0_46 = arith.constant 0 : index
      %c0_47 = arith.constant 0 : index
      %61 = arith.index_cast %60 : i32 to index
      %62 = vector.load %arg10[%c0_46, %c0_47, %61] : memref<1x8x4096xf32, #tpu.memory_space<vmem>>, vector<1x8x4096xf32>
      %63 = vector.shape_cast %62 : vector<1x8x4096xf32> to vector<8x4096xf32>
      %64 = vector.broadcast %56 : vector<8x1xf32> to vector<8x4096xf32>
      %65 = arith.mulf %63, %64 : vector<8x4096xf32>
      %c0_48 = arith.constant 0 : index
      %c0_49 = arith.constant 0 : index
      %66 = arith.index_cast %60 : i32 to index
      %67 = vector.load %arg10[%c0_48, %c0_49, %66] : memref<1x8x4096xf32, #tpu.memory_space<vmem>>, vector<1x8x4096xf32>
      %68 = vector.shape_cast %67 : vector<1x8x4096xf32> to vector<8x4096xf32>
      %69 = vector.shape_cast %65 : vector<8x4096xf32> to vector<1x8x4096xf32>
      tpu.vector_store %arg10[%c0_48, %c0_49, %66], %69 {strides = array<i32>} : memref<1x8x4096xf32, #tpu.memory_space<vmem>>, vector<1x8x4096xf32>,
      %c1_i32_50 = arith.constant 1 : i32
    } else {
    }
    return
  }
  func.func @transform_0(%arg0: i32, %arg1: i32) -> (i32, i32, i32) {
    %c0_i32 = arith.constant 0 : i32
    %c0_i32_0 = arith.constant 0 : i32
    return %arg0, %c0_i32, %arg1 : i32, i32, i32
  }
  func.func @transform_1(%arg0: i32, %arg1: i32) -> (i32, i32) {
    %c0_i32 = arith.constant 0 : i32
    %c0_i32_0 = arith.constant 0 : i32
    %c0_i32_1 = arith.constant 0 : i32
    return %c0_i32, %c0_i32_0 : i32, i32
  }
  func.func @transform_2(%arg0: i32, %arg1: i32) -> (i32, i32) {
    %c0_i32 = arith.constant 0 : i32
    %c0_i32_0 = arith.constant 0 : i32
    %c0_i32_1 = arith.constant 0 : i32
    return %c0_i32, %c0_i32_0 : i32, i32
  }
  func.func @transform_3(%arg0: i32, %arg1: i32) -> (i32, i32) {
    %c0_i32 = arith.constant 0 : i32
    %c0_i32_0 = arith.constant 0 : i32
    %c0_i32_1 = arith.constant 0 : i32
    return %c0_i32, %c0_i32_0 : i32, i32
  }
  func.func @transform_4(%arg0: i32, %arg1: i32) -> (i32, i32) {
    %c0_i32 = arith.constant 0 : i32
    %c0_i32_0 = arith.constant 0 : i32
    %c0_i32_1 = arith.constant 0 : i32
    return %c0_i32, %c0_i32_0 : i32, i32
  }
  func.func @transform_5(%arg0: i32, %arg1: i32) -> (i32, i32) {
    %c0_i32 = arith.constant 0 : i32
    %c0_i32_0 = arith.constant 0 : i32
    %c0_i32_1 = arith.constant 0 : i32
    return %c0_i32, %c0_i32_0 : i32, i32
  }
  func.func @transform_6(%arg0: i32, %arg1: i32) -> (i32, i32) {
    %c0_i32 = arith.constant 0 : i32
    %c0_i32_0 = arith.constant 0 : i32
    %c0_i32_1 = arith.constant 0 : i32
    return %c0_i32, %c0_i32_0 : i32, i32
  }
  func.func @transform_7(%arg0: i32, %arg1: i32) -> (i32, i32) {
    %c0_i32 = arith.constant 0 : i32
    %c0_i32_0 = arith.constant 0 : i32
    %c0_i32_1 = arith.constant 0 : i32
    return %c0_i32, %c0_i32_0 : i32, i32
  }
  func.func @transform_8(%arg0: i32, %arg1: i32) -> (i32, i32, i32) {
    %c0_i32 = arith.constant 0 : i32
    %c0_i32_0 = arith.constant 0 : i32
    %c0_i32_1 = arith.constant 0 : i32
    return %arg0, %c0_i32, %c0_i32_0 : i32, i32, i32
  }
}

</mosaic_0001>

<bundles_post_ra>
// kernel: tpu_custom_call.1
= control target key start
LH: loop header
LB: loop body
LE: loop exit
PB: predicated region body
PF: predicated region fallthrough
CT: control target
= control target key end

     0   :  { %13 = vsyncpa [#allocation5], 0  ;;  %s1754_s0 = inlined_call_operand.hbm [shape: f32[2,8,4096], index: 0, kind: input, shape index: {}]   ;;  %s1755_s1 = inlined_call_operand.vmem [shape: f32[4,8], index: 1, kind: input, shape index: {}]   ;;  %s1756_s2 = inlined_call_operand.vmem [shape: f32[4,1], index: 2, kind: input, shape index: {}]   ;;  %s1757_s3 = inlined_call_operand.vmem [shape: f32[8,4], index: 3, kind: input, shape index: {}]   ;;  %s1758_s4 = inlined_call_operand.vmem [shape: f32[8,1], index: 4, kind: input, shape index: {}]   ;;  %s1759_s5 = inlined_call_operand.vmem [shape: f32[8,8], index: 5, kind: input, shape index: {}]   ;;  %s1760_s6 = inlined_call_operand.vmem [shape: f32[8,8], index: 6, kind: input, shape index: {}]   ;;  %s1761_s7 = inlined_call_operand.vmem [shape: f32[8,1], index: 7, kind: input, shape index: {}]   ;;  %s1762_s8 = inlined_call_operand.hbm [shape: f32[2,8,4096], index: 8, kind: output, shape index: {}]  }
   0x1   :  { %15 = vsyncpa [#allocation5 + $0x1], 0 }
   0x2   :  { %16 = vsyncpa [#allocation6], 0 }
   0x3   :  { %18 = vsyncpa [#allocation6 + $0x1], 0  ;;  %s1316_s27 = smov 0   ;;  %s1318_s28 = smov 0  }
   0x4   :  { %s1320_s29 = smov 0   ;;  %s1322_s30 = smov 0  }
   0x5   :  { %s1324_s9 = smov 0   ;;  %s1326_s10 = smov 0  }
   0x6 LB: > { %s1025_s11 = sadd.s32 4294967295, %s1261_s10   ;;  %s1026_s12 = sadd.s32 4294967294, %s1261_s10   ;;  %s1261_s10 = sphi %s1326_s10, %s24_s10   ;;  %s1257_s9 = sphi %s1324_s9, %s1778_s9   ;;  %s1253_s30 = sphi %s1322_s30, %s1777_s30   ;;  %s1249_s29 = sphi %s1320_s29, %s1776_s29   ;;  %s1245_s28 = sphi %s1318_s28, %s1775_s28   ;;  %s1241_s27 = sphi %s1316_s27, %s1774_s27  }
   0x7   : > { %s36_s13 = sadd.s32 1, %s1257_s9  ;;  %s45_s14 = sadd.s32 1, %s1249_s29 }
   0x8   : > { %p38_p0 = scmp.ge.s32.totalorder %s36_s13, 2  ;;  %p52_p1 = scmp.ne.s32.totalorder %s1249_s29, %s1245_s28 }
   0x9   : > { %p53_p2 = scmp.eq.s32.totalorder %s1261_s10, 0  ;;  %p58_p3 = scmp.ne.s32.totalorder %s1245_s28, %s1241_s27 }
   0xa   : > { %s1780_s13 = smov (%p38_p0, %s36_s13), 0  ;;  %p59_p5 = scmp.eq.s32.totalorder %s1025_s11, 0 }
   0xb   : > { %p1357_p4 = por %p53_p2, %p52_p1  ;;  %s40_s16 = ssub.s32 %s1257_s9, %s1780_s13 }
   0xc   : > { %p229_p6 = scmp.eq.s32.totalorder %s1025_s11, 1  ;;  %p43_p7 = scmp.eq.s32.totalorder %s40_s16, 0 }
   0xd   : > { %p1363_p8 = por %p59_p5, %p58_p3  ;;  %p235_p10 = scmp.eq.s32.totalorder %s1026_s12, 1 }
   0xe   : > { %p1367_p9 = por %p229_p6, %p52_p1  ;;  %p1087_p13 = scmp.lt.s32.totalorder %s1261_s10, 2 }
   0xf   : > { %s1372_s19 = scalar_select %p43_p7, %s1249_s29, %s45_s14  }
  0x10   : > { %s1766_s18 = scalar_select %p1367_p9, 1, 0 }
  0x11   : > { %p1374_p11 = por %p235_p10, %p58_p3  ;;  %s276_s21 = sand.u32 1, %s1249_s29  }
  0x12   : > { %s1029_s22 = sshll.u32 %s276_s21, 8  ;;  %s1045_s23 = sshll.u32 %s1257_s9, 12 }
  0x13   : > { %s1767_s20 = scalar_select %p1374_p11, 1, 0 }
  0x14   : > { %s1385_s26 = scalar_lea.hbm %s1754_s0, %s1045_s23  ;;  %s280_s11 = scalar_lea.vmem [#allocation4], %s1029_s22 }
  0x15   : > { %s290_s12 = sshll.u32 %s280_s11, 4  ;;  %p1391_p0 = pnand %p1087_p13, %p1357_p4  ;;  %s1387_s12 = int_to_ptr.vmem [resolvable:$true] %s290_s12 }
  0x16   : > { %s277_s16 = scalar_lea.sflag [#allocation5], %s276_s21  ;;  %s1149_s23 = scalar_lea.hbm %s1385_s26, 4096 }
  0x17   : > { %p1150_p3 = scmp.ne.s32.totalorder %s1385_s26, %s1149_s23  ;;  %p1151_p5 = pneg %p1391_p0 }
  0x18   : > { %s1154_s15 = scalar_lea.hbm %s1754_s0, 8192  ;;  %p1155_p4 = scmp.lt.u32.totalorder %s1385_s26, %s1754_s0 }
  0x19   : > { %p1152_p6 = pnand %p1151_p5, %p1150_p3  ;;  %p1156_p10 = scmp.lt.u32.totalorder %s1154_s15, %s1149_s23 }
  0x1a   : > { %p1158_p12 = scmp.lt.u32.totalorder %s1149_s23, %s1385_s26 }
  0x1b   : > { %p1153_p7 = pneg %p1152_p6  ;;  %p1157_p13 = por %p1156_p10, %p1155_p4 }
  0x1d   : > { %p1159_p1 = por %p1158_p12, %p1157_p13 }
  0x1f   : > { %p1160_p2 = pnand %p1159_p1, %p1153_p7 }
  0x21   : > { %1163 = shalt.err (!%p1160_p2)
}
  0x22   : > { %s1164_s21 = scalar_lea.vmem %s1387_s12, 4096  ;;  %s1263_s22 = smov [#allocation4]  }
  0x23   : > { %p1165_p3 = scmp.ne.s32.totalorder %s1387_s12, %s1164_s21  ;;  %s1169_s24 = sshll.u32 %s1263_s22, 4  ;;  %s1170_s24 = int_to_ptr.vmem [resolvable:$false] %s1169_s24 }
  0x24   : > { %s1171_s25 = scalar_lea.vmem %s1170_s24, 8192  ;;  %p1172_p9 = scmp.lt.s32.totalorder %s1387_s12, %s1170_s24 }
  0x25   : > { %p1167_p6 = pnand %p1165_p3, %p1151_p5  ;;  %p1173_p4 = scmp.lt.s32.totalorder %s1171_s25, %s1164_s21 }
  0x27   : > { %p1168_p11 = pneg %p1167_p6  ;;  %p1174_p10 = por %p1173_p4, %p1172_p9 }
  0x29   : > { %p1175_p12 = pnand %p1174_p10, %p1168_p11 }
  0x2b   : > { %1178 = shalt.err (!%p1175_p12)
}
  0x2c   : > { %1082 = dma.hbm_to_vmem [thread:$0]  (!%p1391_p0), %s1385_s26, 4096, %s1387_s12, %s277_s16  }
  0x2d   : > { %p1769_p1 = scmp.lt.s32.totalorder %s1261_s10, 3  ;;  %p1770_p2 = scmp.ge.s32.totalorder %s1261_s10, 1 }
  0x2f   : > { %p296_p5 = pnand %p1770_p2, %p1769_p1 }
  0x30   : > { %s1427_s23 = sand.u32 (!%p296_p5), 1, %s1245_s28  }
  0x31   : > { %299 = sbr.rel (%p296_p5) target bundleno = 1298 (0x512), region = 52  ;;  %s1033_s15 = sshll.u32 (!%p296_p5), %s1427_s23, 8 }
  0x32   : > { %s302_s11 = scalar_lea.sflag (!%p296_p5), [#allocation5], %s1427_s23  ;;  %s1433_s14 = scalar_lea.vmem (!%p296_p5), [#allocation4], %s1033_s15 }
  0x38   : > { %1232 = dma.done.wait (%p1363_p8), %s302_s11, 4096  }
  0x39   : > { %1234 = vsyncadd (%p1363_p8), %s302_s11, 4294963200  ;;  %vm343_vm0 = vcmask 7168   ;;  %v1264_v0 = vmov -inf   ;;  %v1441_v1 = vld [vmem:[%s1433_s14] sm:$0xff]  ;;  %v1444_v2 = vld [vmem:[%s1433_s14 + $0x8] sm:$0xff]  ;;  %vm1266_vm1 = vmmov 0  }
  0x3a   : > { %345 = vst.msk [vmem:[#allocation3] sm:$0xff] %vm343_vm0, %v1264_v0  ;;  %v1447_v3 = vld [vmem:[%s1433_s14 + $0x10] sm:$0xff]  ;;  %v1450_v4 = vld [vmem:[%s1433_s14 + $0x18] sm:$0xff]  ;;  %v1453_v5 = vld [vmem:[%s1433_s14 + $0x20] sm:$0xff]  ;;  %v378_v7 = vadd.f32 %v1444_v2, %v1441_v1  ;;  %s1268_s17 = smov 1   ;;  %vm511_vm2 = vcmask 64512  }
  0x3b   : > { %v1456_v6 = vld [vmem:[%s1433_s14 + $0x28] sm:$0xff]  ;;  %v1461_v8 = vld [vmem:[%s1433_s14 + $0x30] sm:$0xff]  ;;  %v1464_v9 = vld [vmem:[%s1433_s14 + $0x38] sm:$0xff]  ;;  %v411_v11 = vmax.f32 %v1441_v1, %v1453_v5  ;;  %vm595_vm3 = vcmask 1043456   ;;  %vm591_vm4 = vcmask 31744   ;;  %s1269_s26 = smov 127  }
  0x3c   : > { %v1467_v10 = vld [vmem:[%s1433_s14 + $0x40] sm:$0xff]  ;;  %v412_v12 = vmax.f32 %v1444_v2, %v1456_v6  ;;  %v1474_v13 = vld [vmem:[%s1433_s14 + $0x48] sm:$0xff]  ;;  %v1477_v14 = vld [vmem:[%s1433_s14 + $0x50] sm:$0xff]  ;;  %v413_v16 = vmax.f32 %v1447_v3, %v1461_v8  ;;  %v414_v17 = vmax.f32 %v1450_v4, %v1464_v9  ;;  %v379_v18 = vadd.f32 %v378_v7, %v1447_v3  ;;  %s1646_s24 = scalar_lea.vmem [#allocation7], %s1033_s15  ;;  %s1046_s15 = sshll.u32 %s1253_s30, 12 }
  0x3d   : > { %v1480_v15 = vld [vmem:[%s1433_s14 + $0x58] sm:$0xff]  ;;  %v1488_v19 = vld [vmem:[%s1433_s14 + $0x60] sm:$0xff]  ;;  %v1491_v20 = vld [vmem:[%s1433_s14 + $0x68] sm:$0xff]  ;;  %v415_v22 = vmax.f32 %v411_v11, %v1467_v10  ;;  %s942_s25 = sshll.u32 %s1646_s24, 4  ;;  %p1771_p9 = scmp.ne.s32.totalorder %s1766_s18, 0  ;;  %s1699_s25 = int_to_ptr.vmem [resolvable:$true] %s942_s25 }
  0x3e   : > { %v1494_v21 = vld [vmem:[%s1433_s14 + $0x70] sm:$0xff]  ;;  %v416_v23 = vmax.f32 %v412_v12, %v1474_v13  ;;  %v1499_v24 = vld [vmem:[%s1433_s14 + $0x78] sm:$0xff]  ;;  %v1502_v25 = vld [vmem:[%s1433_s14 + $0x80] sm:$0xff]  ;;  %v417_v27 = vmax.f32 %v413_v16, %v1477_v14  ;;  %v418_v28 = vmax.f32 %v414_v17, %v1480_v15  ;;  %v380_v29 = vadd.f32 %v379_v18, %v1450_v4  ;;  %s1270_s12 = smov [#allocation7]  }
  0x3f   : > { %v1505_v26 = vld [vmem:[%s1433_s14 + $0x88] sm:$0xff]  ;;  %v1511_v30 = vld [vmem:[%s1433_s14 + $0x90] sm:$0xff]  ;;  %v1514_v31 = vld [vmem:[%s1433_s14 + $0x98] sm:$0xff]  ;;  %v419_v32 = vmax.f32 %v415_v22, %v1488_v19  ;;  %s1183_s16 = sshll.u32 %s1270_s12, 4  ;;  %s1184_s16 = int_to_ptr.vmem [resolvable:$false] %s1183_s16 }
  0x40   : > { %v420_v33 = vmax.f32 %v416_v23, %v1491_v20  ;;  %v1519_v34 = vld [vmem:[%s1433_s14 + $0xa0] sm:$0xff]  ;;  %v1522_v35 = vld [vmem:[%s1433_s14 + $0xa8] sm:$0xff]  ;;  %v421_v36 = vmax.f32 %v417_v27, %v1494_v21  ;;  %v422_v37 = vmax.f32 %v418_v28, %v1499_v24  ;;  %v381_v38 = vadd.f32 %v380_v29, %v1453_v5  ;;  %v1528_v39 = vld [vmem:[%s1433_s14 + $0xb0] sm:$0xff]  ;;  %s1185_s21 = scalar_lea.vmem %s1184_s16, 8192  ;;  %p1186_p7 = scmp.lt.s32.totalorder %s1699_s25, %s1184_s16 }
  0x41   : > { %v1531_v40 = vld [vmem:[%s1433_s14 + $0xb8] sm:$0xff]  ;;  %v423_v41 = vmax.f32 %v419_v32, %v1502_v25  ;;  %v1536_v43 = vld [vmem:[%s1433_s14 + $0xc0] sm:$0xff]  ;;  %v1539_v44 = vld [vmem:[%s1433_s14 + $0xc8] sm:$0xff] }
  0x42   : > { %v424_v42 = vmax.f32 %v420_v33, %v1505_v26  ;;  %v425_v45 = vmax.f32 %v421_v36, %v1511_v30  ;;  %v426_v46 = vmax.f32 %v422_v37, %v1514_v31  ;;  %v382_v47 = vadd.f32 %v381_v38, %v1456_v6  ;;  %v1545_v48 = vld [vmem:[%s1433_s14 + $0xd0] sm:$0xff]  ;;  %v1548_v49 = vld [vmem:[%s1433_s14 + $0xd8] sm:$0xff]  ;;  %v1553_v52 = vld [vmem:[%s1433_s14 + $0xe0] sm:$0xff] }
  0x43   : > { %v427_v50 = vmax.f32 %v423_v41, %v1519_v34  ;;  %v1556_v53 = vld [vmem:[%s1433_s14 + $0xe8] sm:$0xff]  ;;  %v1562_v57 = vld [vmem:[%s1433_s14 + $0xf0] sm:$0xff]  ;;  %v1565_v58 = vld [vmem:[%s1433_s14 + $0xf8] sm:$0xff]  ;;  %s1697_s14 = scalar_lea.hbm %s1762_s8, %s1046_s15 }
  0x44   : > { %v428_v51 = vmax.f32 %v424_v42, %v1522_v35  ;;  %v429_v54 = vmax.f32 %v425_v45, %v1528_v39  ;;  %v430_v55 = vmax.f32 %v426_v46, %v1531_v40  ;;  %v383_v56 = vadd.f32 %v382_v47, %v1461_v8 }
  0x45   : > { %v431_v59 = vmax.f32 %v427_v50, %v1536_v43 }
  0x46   : > { %v432_v60 = vmax.f32 %v428_v51, %v1539_v44  ;;  %v433_v61 = vmax.f32 %v429_v54, %v1545_v48  ;;  %v434_v62 = vmax.f32 %v430_v55, %v1548_v49  ;;  %v384_v63 = vadd.f32 %v383_v56, %v1464_v9 }
  0x47   : > { %v435_v0 = vmax.f32 %v431_v59, %v1553_v52  ;;  %v1265_v51 = vmov 0.0  }
  0x48   : > { %v436_v7 = vmax.f32 %v432_v60, %v1556_v53  ;;  %v437_v11 = vmax.f32 %v433_v61, %v1562_v57  ;;  %v438_v12 = vmax.f32 %v434_v62, %v1565_v58  ;;  %v385_v16 = vadd.f32 %v384_v63, %v1467_v10  ;;  %344 = vst.msk [vmem:[#allocation2] sm:$0xff] %vm343_vm0, %v1265_v51 }
  0x49   : > { %1055 = vmatprep.subr.mxu0 %v1265_v51  ;;  %1060 = vmatprep.subr.mxu1 %v1265_v51 }
  0x4a   : > { %v439_v17 = vmax.f32 %v435_v0, %v436_v7  ;;  %v440_v18 = vmax.f32 %v437_v11, %v438_v12  ;;  %v386_v22 = vadd.f32 %v385_v16, %v1474_v13  ;;  %v448_v0 = vld [vmem:[#allocation3] sm:$0xff]  ;;  %1057 = vmatprep.mubr.msk.f32.mxu0 %vm1266_vm1, %v1265_v51  ;;  %1062 = vmatprep.mubr.msk.f32.mxu1 %vm1266_vm1, %v1265_v51  ;;  %v1267_v12 = vmov 0  }
  0x4b   : > { %1143 = vset.pattern.permute.xlu1 %v1267_v12  ;;  %1144 = vset.pattern.permute.xlu0 %v1267_v12 }
  0x4c   : > { %v441_v23 = vmax.f32 %v439_v17, %v440_v18  ;;  %v387_v27 = vadd.f32 %v386_v22, %v1477_v14  ;;  %v495_v17 = vld [vmem:[%s1756_s2] sm:$0xf] }
  0x4e   : > { %442 = vmax.xlane.f32.xlu0 %v441_v23  ;;  %v388_v28 = vadd.f32 %v387_v27, %v1480_v15 }
  0x4f   : > { %v444_v18 = vld [vmem:[#allocation2] sm:$0xff] }
  0x50   : > { %v389_v29 = vadd.f32 %v388_v28, %v1488_v19 }
  0x52   : > { %v390_v32 = vadd.f32 %v389_v29, %v1491_v20 }
  0x54   : > { %v391_v33 = vadd.f32 %v390_v32, %v1494_v21  ;;  %v494_v32 = vld [vmem:[%s1755_s1] sm:$0xf] }
  0x56   : > { %v392_v36 = vadd.f32 %v391_v33, %v1499_v24 }
  0x58   : > { %v393_v37 = vadd.f32 %v392_v36, %v1502_v25  ;;  %v497_v36 = vld [vmem:[%s1758_s4] sm:$0xff] }
  0x5a   : > { %v394_v38 = vadd.f32 %v393_v37, %v1505_v26 }
  0x5c   : > { %v395_v41 = vadd.f32 %v394_v38, %v1511_v30 }
  0x5e   : > { %v396_v42 = vadd.f32 %v395_v41, %v1514_v31 }
  0x60   : > { %v397_v45 = vadd.f32 %v396_v42, %v1519_v34 }
  0x62   : > { %v398_v46 = vadd.f32 %v397_v45, %v1522_v35 }
  0x64   : > { %v399_v47 = vadd.f32 %v398_v46, %v1528_v39  ;;  %v496_v46 = vld [vmem:[%s1757_s3] sm:$0xff] }
  0x66   : > { %v400_v50 = vadd.f32 %v399_v47, %v1531_v40 }
  0x68   : > { %v401_v54 = vadd.f32 %v400_v50, %v1536_v43 }
  0x6a   : > { %v402_v55 = vadd.f32 %v401_v54, %v1539_v44 }
  0x6c   : > { %v403_v56 = vadd.f32 %v402_v55, %v1545_v48 }
  0x6e   : > { %v404_v59 = vadd.f32 %v403_v56, %v1548_v49  ;;  %v498_v56 = vld [vmem:[%s1759_s5] sm:$0xff] }
  0x70   : > { %v405_v60 = vadd.f32 %v404_v59, %v1553_v52  ;;  %v499_v59 = vld [vmem:[%s1760_s6] sm:$0xff] }
  0x72   : > { %v406_v61 = vadd.f32 %v405_v60, %v1556_v53 }
  0x74   : > { %v407_v62 = vadd.f32 %v406_v61, %v1562_v57 }
  0x76   : > { %v408_v63 = vadd.f32 %v407_v62, %v1565_v58 }
  0x78   : > { %409 = vadd.xlane.f32.xlu0 %v408_v63  ;;  %v500_v63 = vld [vmem:[%s1761_s7] sm:$0xff] }
  0x8e   : > { %588 = vperm.xlu0 %1144, %v497_v36  }
  0xdb   : > { %v443_v7 = vpop.xlane.xlu0 %442 }
  0xdc   : > { %v449_v11 = vmax.f32 %v448_v0, %v443_v7 }
  0xde   : > { %450 = vst.msk [vmem:[#allocation3] sm:$0xff] %vm343_vm0, %v449_v11 }
  0xe5   : > { %v493_v16 = vld [vmem:[#allocation3] sm:$0xff] }
  0xe6   : > { %502 = vrot.lane.b32.xlu1 %v493_v16, %s1268_s17  ;;  %s928_s17 = scalar_lea.sflag [#allocation6], %s1427_s23 }
  0xea   : > { %508 = vperm.xlu1 %1143, %v495_v17  }
 0x105   : > { %v410_v22 = vpop.xlane.xlu0 %409 }
 0x106   : > { %v445_v23 = vadd.f32 %v444_v18, %v410_v22 }
 0x108   : > { %447 = vst.msk [vmem:[#allocation2] sm:$0xff] %vm343_vm0, %v445_v23 }
 0x10d   : > { %v589_v47 = vpop.permute.xlu0 %588 }
 0x10f   : > { %v491_v27 = vld [vmem:[#allocation2] sm:$0xff] }
 0x110   : > { %v492_v28 = vmul.f32 0.00024414063, %v491_v27 }
 0x158   : > { %v503_v29 = vpop.permute.xlu1 %502 }
 0x159   : > { %v505_v33 = vsel %vm343_vm0, %v492_v28, %v503_v29 }
 0x15a   : > { %1056 = vmatpush3.msra.mxu0 %v505_v33 }
 0x15b   : > { %1058 = vmatmul.mubr.msk.f32.vlgmr.msra.gmra.mrb[0].mxu0 %vm511_vm2, %v494_v32  ;;  %1065 = vmatprep.subr.mxu0 %v1265_v51 }
 0x15c   : > { %1067 = vmatprep.mubr.msk.f32.mxu0 %vm1266_vm1, %v1265_v51 }
 0x169   : > { %v509_v37 = vpop.permute.xlu1 %508 }
 0x22e   : > { %v581_v38 = vpop.f32.mrb[0].mxu0 }
 0x22f   : > { %v582_v41 = vadd.f32 %v581_v38, %v509_v37  ;;  %v1059_v42 = vpop.f32.mrb[1].mxu0 }
 0x231   : > { %v585_v45 = vmax.f32 %v582_v41, 0.0 }
 0x233   : > { %1061 = vmatpush3.msk.msra.mxu1 %vm595_vm3, %v585_v45 }
 0x234   : > { %1063 = vmatmul.mubr.msk.f32.vlgmr.msra.gmra.mrb[0].mxu1 %vm591_vm4, %v496_v46  ;;  %1070 = vmatprep.subr.mxu1 %v1265_v51 }
 0x235   : > { %1072 = vmatprep.mubr.msk.f32.mxu1 %vm1266_vm1, %v1265_v51 }
 0x307   : > { %v665_v50 = vpop.f32.mrb[0].mxu1 }
 0x308   : > { %v666_v54 = vadd.f32 %v665_v50, %v589_v47  ;;  %v1064_v55 = vpop.f32.mrb[1].mxu1 }
 0x30a   : > { %670 = vrot.lane.b32.xlu1 %v666_v54, %s1269_s26  ;;  %1071 = vmatpush3.msra.mxu1 %v666_v54  ;;  %s1179_s26 = scalar_lea.vmem %s1699_s25, 4096 }
 0x30b   : > { %1073 = vmatmul.mubr.msk.f32.vlgmr.msra.gmra.mrb[2].mxu1 %vm511_vm2, %v498_v56  ;;  %p1180_p8 = scmp.ne.s32.totalorder %s1699_s25, %s1179_s26  ;;  %p1187_p13 = scmp.lt.s32.totalorder %s1185_s21, %s1179_s26 }
 0x30d   : > { %p1181_p11 = pnand %p1180_p8, %p1771_p9  ;;  %p1188_p3 = por %p1187_p13, %p1186_p7 }
 0x30f   : > { %p1182_p0 = pneg %p1181_p11 }
 0x311   : > { %p1189_p6 = pnand %p1188_p3, %p1182_p0 }
 0x37c   : > { %v671_v60 = vpop.permute.xlu1 %670 }
 0x37d   : > { %1066 = vmatpush3.msra.mxu0 %v671_v60 }
 0x37e   : > { %1068 = vmatmul.mubr.msk.f32.vlgmr.msra.gmra.mrb[2].mxu0 %vm511_vm2, %v499_v59 }
 0x3de   : > { %v815_v51 = vpop.f32.mrb[2].mxu1 }
 0x3df   : > { %v1074_v61 = vpop.f32.mrb[3].mxu1 }
 0x451   : > { %v742_v62 = vpop.f32.mrb[2].mxu0 }
 0x452   : > { %v816_v0 = vadd.f32 %v815_v51, %v742_v62  ;;  %v1069_v7 = vpop.f32.mrb[3].mxu0 }
 0x454   : > { %v819_v11 = vadd.f32 %v816_v0, %v500_v63 }
 0x456   : > { %v820_v12 = vsub.f32 0.0, %v819_v11 }
 0x458   : > { %v821_v16 = vmul.f32 1.442695, %v820_v12 }
 0x45a   : > { %1145 = vpow2.f32 %v821_v16 }
 0x464   : > { %v1146_v17 = vpop.eup %1145 }
 0x465   : > { %v823_v18 = vadd.f32 1.0, %v1146_v17 }
 0x467   : > { %1147 = vrcp.f32 %v823_v18 }
 0x471   : > { %v1148_v22 = vpop.eup %1147 }
 0x472   : > { %860 = vperm.xlu1 %1143, %v1148_v22  }
 0x4f1   : > { %v861_v23 = vpop.permute.xlu1 %860 }
 0x4f2   : > { %v863_v27 = vmul.f32 %v861_v23, %v1441_v1  ;;  %v864_v28 = vmul.f32 %v861_v23, %v1444_v2  ;;  %v865_v29 = vmul.f32 %v861_v23, %v1447_v3  ;;  %v866_v32 = vmul.f32 %v861_v23, %v1450_v4 }
 0x4f3   : > { %v867_v33 = vmul.f32 %v861_v23, %v1453_v5  ;;  %v868_v36 = vmul.f32 %v861_v23, %v1456_v6  ;;  %v869_v37 = vmul.f32 %v861_v23, %v1461_v8  ;;  %v870_v38 = vmul.f32 %v861_v23, %v1464_v9 }
 0x4f4   : > { %v871_v41 = vmul.f32 %v861_v23, %v1467_v10  ;;  %v872_v42 = vmul.f32 %v861_v23, %v1474_v13  ;;  %v873_v1 = vmul.f32 %v861_v23, %v1477_v14  ;;  %v874_v2 = vmul.f32 %v861_v23, %v1480_v15  ;;  %895 = vst [vmem:[%s1646_s24] sm:$0xff] %v863_v27 }
 0x4f5   : > { %896 = vst [vmem:[%s1646_s24 + $0x8] sm:$0xff] %v864_v28  ;;  %897 = vst [vmem:[%s1646_s24 + $0x10] sm:$0xff] %v865_v29  ;;  %v875_v3 = vmul.f32 %v861_v23, %v1488_v19  ;;  %v876_v4 = vmul.f32 %v861_v23, %v1491_v20  ;;  %v877_v5 = vmul.f32 %v861_v23, %v1494_v21 }
 0x4f6   : > { %898 = vst [vmem:[%s1646_s24 + $0x18] sm:$0xff] %v866_v32  ;;  %v878_v6 = vmul.f32 %v861_v23, %v1499_v24  ;;  %899 = vst [vmem:[%s1646_s24 + $0x20] sm:$0xff] %v867_v33  ;;  %v879_v8 = vmul.f32 %v861_v23, %v1502_v25  ;;  %v880_v9 = vmul.f32 %v861_v23, %v1505_v26 }
 0x4f7   : > { %900 = vst [vmem:[%s1646_s24 + $0x28] sm:$0xff] %v868_v36  ;;  %901 = vst [vmem:[%s1646_s24 + $0x30] sm:$0xff] %v869_v37  ;;  %v881_v10 = vmul.f32 %v861_v23, %v1511_v30  ;;  %v882_v13 = vmul.f32 %v861_v23, %v1514_v31  ;;  %v883_v14 = vmul.f32 %v861_v23, %v1519_v34 }
 0x4f8   : > { %902 = vst [vmem:[%s1646_s24 + $0x38] sm:$0xff] %v870_v38  ;;  %903 = vst [vmem:[%s1646_s24 + $0x40] sm:$0xff] %v871_v41  ;;  %v884_v15 = vmul.f32 %v861_v23, %v1522_v35  ;;  %v885_v19 = vmul.f32 %v861_v23, %v1528_v39  ;;  %v886_v20 = vmul.f32 %v861_v23, %v1531_v40 }
 0x4f9   : > { %904 = vst [vmem:[%s1646_s24 + $0x48] sm:$0xff] %v872_v42  ;;  %905 = vst [vmem:[%s1646_s24 + $0x50] sm:$0xff] %v873_v1  ;;  %v887_v21 = vmul.f32 %v861_v23, %v1536_v43  ;;  %v888_v24 = vmul.f32 %v861_v23, %v1539_v44  ;;  %v889_v25 = vmul.f32 %v861_v23, %v1545_v48 }
 0x4fa   : > { %906 = vst [vmem:[%s1646_s24 + $0x58] sm:$0xff] %v874_v2  ;;  %907 = vst [vmem:[%s1646_s24 + $0x60] sm:$0xff] %v875_v3  ;;  %v890_v26 = vmul.f32 %v861_v23, %v1548_v49  ;;  %v891_v30 = vmul.f32 %v861_v23, %v1553_v52  ;;  %v892_v31 = vmul.f32 %v861_v23, %v1556_v53 }
 0x4fb   : > { %908 = vst [vmem:[%s1646_s24 + $0x68] sm:$0xff] %v876_v4  ;;  %909 = vst [vmem:[%s1646_s24 + $0x70] sm:$0xff] %v877_v5  ;;  %v893_v34 = vmul.f32 %v861_v23, %v1562_v57  ;;  %v894_v35 = vmul.f32 %v861_v23, %v1565_v58 }
 0x4fc   : > { %910 = vst [vmem:[%s1646_s24 + $0x78] sm:$0xff] %v878_v6  ;;  %911 = vst [vmem:[%s1646_s24 + $0x80] sm:$0xff] %v879_v8 }
 0x4fd   : > { %912 = vst [vmem:[%s1646_s24 + $0x88] sm:$0xff] %v880_v9  ;;  %913 = vst [vmem:[%s1646_s24 + $0x90] sm:$0xff] %v881_v10 }
 0x4fe   : > { %914 = vst [vmem:[%s1646_s24 + $0x98] sm:$0xff] %v882_v13  ;;  %915 = vst [vmem:[%s1646_s24 + $0xa0] sm:$0xff] %v883_v14 }
 0x4ff   : > { %916 = vst [vmem:[%s1646_s24 + $0xa8] sm:$0xff] %v884_v15  ;;  %917 = vst [vmem:[%s1646_s24 + $0xb0] sm:$0xff] %v885_v19 }
 0x500   : > { %918 = vst [vmem:[%s1646_s24 + $0xb8] sm:$0xff] %v886_v20  ;;  %919 = vst [vmem:[%s1646_s24 + $0xc0] sm:$0xff] %v887_v21 }
 0x501   : > { %920 = vst [vmem:[%s1646_s24 + $0xc8] sm:$0xff] %v888_v24  ;;  %921 = vst [vmem:[%s1646_s24 + $0xd0] sm:$0xff] %v889_v25 }
 0x502   : > { %922 = vst [vmem:[%s1646_s24 + $0xd8] sm:$0xff] %v890_v26  ;;  %923 = vst [vmem:[%s1646_s24 + $0xe0] sm:$0xff] %v891_v30 }
 0x503   : > { %924 = vst [vmem:[%s1646_s24 + $0xe8] sm:$0xff] %v892_v31  ;;  %925 = vst [vmem:[%s1646_s24 + $0xf0] sm:$0xff] %v893_v34 }
 0x504   : > { %926 = vst [vmem:[%s1646_s24 + $0xf8] sm:$0xff] %v894_v35 }
 0x505   : > { %1192 = shalt.err (!%p1189_p6)
}
 0x506   : > { %s1193_s23 = scalar_lea.hbm %s1697_s14, 4096  ;;  %s1197_s15 = scalar_lea.hbm %s1762_s8, 8192 }
 0x507   : > { %p1194_p4 = scmp.ne.s32.totalorder %s1697_s14, %s1193_s23  ;;  %p1198_p1 = scmp.lt.u32.totalorder %s1697_s14, %s1762_s8 }
 0x508   : > { %p1199_p2 = scmp.lt.u32.totalorder %s1197_s15, %s1193_s23  ;;  %p1201_p8 = scmp.lt.u32.totalorder %s1193_s23, %s1697_s14 }
 0x509   : > { %p1195_p10 = pnand %p1194_p4, %p1771_p9 }
 0x50a   : > { %p1200_p5 = por %p1199_p2, %p1198_p1 }
 0x50b   : > { %p1196_p12 = pneg %p1195_p10 }
 0x50c   : > { %p1202_p11 = por %p1201_p8, %p1200_p5 }
 0x50e   : > { %p1203_p0 = pnand %p1202_p11, %p1196_p12 }
 0x510   : > { %1206 = shalt.err (!%p1203_p0)
}
 0x511   : > { %1077 = dma.vmem_to_hbm [thread:$0]  (%p1771_p9), %s1699_s25, 4096, %s1697_s14, %s928_s17  }
 0x512 PF: > { %s954_s26 = sand.u32 1, %s1241_s27   ;;  %p1772_p7 = scmp.ne.s32.totalorder %s1767_s20, 0 }
 0x513   : > { %p1773_p13 = scmp.ge.s32.totalorder %s1261_s10, 2  ;;  %s955_s12 = scalar_lea.sflag [#allocation6], %s954_s26 }
 0x515   : > { %p1084_p3 = pnand %p1773_p13, %p1772_p7 }
 0x517   : > { %1236 = dma.done.wait (!%p1084_p3), %s955_s12, 4096  }
 0x518   : > { %1238 = vsyncadd (!%p1084_p3), %s955_s12, 4294963200  ;;  %s24_s10 = sadd.s32 1, %s1261_s10   ;;  %s1774_s27 = smov %s1245_s28 }
 0x519   : > { %p21_p6 = scmp.ge.s32.totalorder %s24_s10, 4   ;;  %s1775_s28 = smov %s1249_s29 }
 0x51a   : > { %s1776_s29 = smov %s1372_s19  ;;  %s1777_s30 = smov %s1257_s9 }
 0x51b   : > { %s1778_s9 = smov %s1780_s13  ;;  %23 = sbr.rel (!%p21_p6) target bundleno = 6 (0x6), region = 106 }
 0x522   :  { %960 = vsyncpa [#allocation5], 1 }
 0x523   :  { %962 = vsyncpa [#allocation5 + $0x1], 1 }
 0x524   :  { %963 = vsyncpa [#allocation6], 1 }
 0x525   :  { %965 = vsyncpa [#allocation6 + $0x1], 1 }

</bundles_post_ra>
